<compile_context>
chip_gen: v7x
topology: tpu7x:2x2x1
jax: 0.10.0
libtpu: 0.0.40
codegen_flags: <defaults>
</compile_context>

<pallas_src>
import jax
import jax.numpy as jnp
from jax.experimental import pallas as pl
from jax.experimental.pallas import tpu as pltpu


# ----------------------------------------------------------------------------
# helpers
# ----------------------------------------------------------------------------
def _round_up(v, m):
    return ((v + m - 1) // m) * m


def _choose_row_tile(M):
    # TM is the lane (last) dim of every tile / output block -> multiple of 128.
    # Large tiles amortize per-grid-step overhead; per-step working set stays
    # small (few hundred KiB even at Cin=64 / Cmid=256), well under the scoped
    # VMEM default on all generations, and under v7x's 64 MiB physical VMEM.
    return max(128, min(1024, _round_up(M, 128)))


# ----------------------------------------------------------------------------
# Fused kernel: 3x3 conv (one K=9*Cin matmul) + bias + PReLU + block-diag 1x1
# ----------------------------------------------------------------------------
def _make_upsample_kernel(TM, HALO, Wp, Cin_k, Cmid):
    # tap offsets in the flattened padded row space (static Python ints)
    offs = [dy * Wp + dx for dy in range(3) for dx in range(3)]

    def kernel(xt_ref, xh_ref, w3_ref, wbig_ref, aux_ref, o_ref,
               buf_ref, patch_ref):
        # Stage current tile + trimmed halo contiguously (bf16, rows on lanes).
        buf_ref[:, :TM] = xt_ref[0]
        buf_ref[:, TM:] = xh_ref[0]

        # Build the (9*Cin_k, TM) tap patch in VMEM scratch: tap t=(dy,dx)
        # contributes all channels shifted by dy*Wp+dx along the lane axis.
        for t, off in enumerate(offs):
            patch_ref[t * Cin_k:(t + 1) * Cin_k, :] = buf_ref[:, off:off + TM]

        # Single fused MXU matmul, bf16 operands, f32 accumulation.
        acc = jnp.dot(w3_ref[...], patch_ref[...],
                      preferred_element_type=jnp.float32)        # (Cmid, TM)

        # Lane-dense epilogue: conv bias + shared-alpha PReLU (elementwise, so
        # it commutes with PixelShuffle) + block-diagonal 1x1 conv + its bias.
        b3 = aux_ref[:, 0:1]          # (Cmid, 1) broadcast along lanes
        alpha = aux_ref[:, 1:2]
        b1 = aux_ref[:, 2:3]
        y = acc + b3
        y = jnp.where(y > 0.0, y, alpha * y)
        z = jnp.dot(wbig_ref[...], y.astype(jnp.bfloat16),
                    preferred_element_type=jnp.float32)          # (Cmid, TM)
        o_ref[0] = (z + b1).astype(jnp.bfloat16)

    return kernel


def _fused_upsample(x_tiles, x_halo, w3m, wbig, aux, *, TM, HALO, Wp, n_tiles):
    N, Cin_k, Mp = x_tiles.shape
    Cmid = w3m.shape[0]
    assert TM % 128 == 0 and Cin_k % 8 == 0
    assert HALO >= 2 * Wp + 2 and HALO % 128 == 0
    assert Mp == n_tiles * TM
    assert x_halo.shape == (N, n_tiles * Cin_k, HALO)

    kernel = _make_upsample_kernel(TM, HALO, Wp, Cin_k, Cmid)
    return pl.pallas_call(
        kernel,
        out_shape=jax.ShapeDtypeStruct((N, Cmid, Mp), jnp.bfloat16),
        grid=(N, n_tiles),
        in_specs=[
            # current row tile (bf16, rows on lanes)
            pl.BlockSpec((1, Cin_k, TM), lambda n, i: (n, 0, i)),
            # trimmed halo slab for this tile (bf16)
            pl.BlockSpec((1, Cin_k, HALO), lambda n, i: (n, i, 0)),
            # fused 3x3 weights (Cmid, 9*Cin_k), bf16 -- grid-invariant
            pl.BlockSpec((Cmid, 9 * Cin_k), lambda n, i: (0, 0)),
            # block-diagonal 1x1 weights (Cmid, Cmid), bf16 -- grid-invariant
            pl.BlockSpec((Cmid, Cmid), lambda n, i: (0, 0)),
            # merged per-channel vectors [b3 | alpha | b1x1], f32
            pl.BlockSpec((Cmid, 3), lambda n, i: (0, 0)),
        ],
        out_specs=pl.BlockSpec((1, Cmid, TM), lambda n, i: (n, 0, i)),
        scratch_shapes=[
            pltpu.VMEM((Cin_k, TM + HALO), jnp.bfloat16),   # tile+halo staging
            pltpu.VMEM((9 * Cin_k, TM), jnp.bfloat16),      # fused tap patch
        ],
        compiler_params=pltpu.CompilerParams(
            # fully independent tiles -> shardable across v7x's 2 TensorCores
            dimension_semantics=("parallel", "parallel"),
        ),
    )(x_tiles, x_halo, w3m, wbig, aux)


# ----------------------------------------------------------------------------
# Full UpsampleBlock forward (NCHW in / NCHW out, matches the PyTorch module)
# ----------------------------------------------------------------------------
def upsample_block_forward(params, x_nchw, upscale_factor):
    r = int(upscale_factor)
    w3 = params["conv_w"]          # (Cmid, Cin, 3, 3), Cmid = out_ch * r^2
    b3 = params["conv_b"]          # (Cmid,)
    alpha = params["prelu_a"]      # (1,) shared PReLU parameter
    w1 = params["conv1x1_w"]       # (Cout, Cout, 1, 1)
    b1 = params["conv1x1_b"]       # (Cout,)

    N, Cin, H, W = x_nchw.shape
    Cmid = w3.shape[0]
    Cout = Cmid // (r * r)

    Hp, Wp = H + 2, W + 2
    M = H * Wp                                   # virtual output rows per image
    TM = _choose_row_tile(M)
    n_tiles = -(-M // TM)
    Mp = n_tiles * TM
    HALO = _round_up(2 * Wp + 2, 128)            # trimmed, lane-padded halo
    Cin_k = _round_up(Cin, 8)                    # sublane-aligned channels
    flat_full = max(Hp * Wp, Mp + HALO)

    # NCHW -> channels-major flattened padded rows (rows on the lane axis), bf16.
    xp = jnp.pad(x_nchw, ((0, 0), (0, 0), (1, 1), (1, 1)))     # (N,Cin,Hp,Wp)
    x_flat = xp.reshape(N, Cin, Hp * Wp)
    x_flat = jnp.pad(x_flat,
                     ((0, 0), (0, Cin_k - Cin), (0, flat_full - Hp * Wp)))
    x_flat = x_flat.astype(jnp.bfloat16)
    x_tiles = x_flat[:, :, :Mp]                                  # (N,Cin_k,Mp)
    x_halo = jnp.concatenate(
        [x_flat[:, :, (i + 1) * TM:(i + 1) * TM + HALO] for i in range(n_tiles)],
        axis=1)                                   # (N, n_tiles*Cin_k, HALO)

    # 3x3 weights -> (Cmid, 9*Cin_k) so the fused tap matmul is W @ patch.
    w3m = jnp.transpose(w3, (0, 2, 3, 1))                       # (Cmid,3,3,Cin)
    w3m = jnp.pad(w3m, ((0, 0), (0, 0), (0, 0), (0, Cin_k - Cin)))
    w3m = w3m.reshape(Cmid, 9 * Cin_k).astype(jnp.bfloat16)

    # 1x1 conv moved before the PixelShuffle as a block-diagonal matrix over
    # the r*r sub-pixel positions (mathematically identical), output-major.
    w1_mat = w1.reshape(Cout, Cout)                              # [out, in]
    eye = jnp.eye(r * r, dtype=jnp.float32)
    wbig = jnp.einsum("oc,pq->oqcp", w1_mat, eye).reshape(Cmid, Cmid)
    wbig = wbig.astype(jnp.bfloat16)
    bbig = jnp.repeat(b1, r * r)                                 # (Cmid,)

    # merge the tiny per-channel vectors into one (Cmid, 3) operand
    aux = jnp.stack(
        [b3, jnp.broadcast_to(alpha.astype(jnp.float32), (Cmid,)), bbig],
        axis=1).astype(jnp.float32)

    u = _fused_upsample(x_tiles, x_halo, w3m, wbig, aux,
                        TM=TM, HALO=HALO, Wp=Wp, n_tiles=n_tiles)  # (N,Cmid,Mp) bf16

    # Drop row padding + the 2 garbage columns per padded row, then the
    # PixelShuffle itself (pure permutation -> reshape/transpose, in bf16).
    u = u[:, :, :M].reshape(N, Cmid, H, Wp)[:, :, :, :W]           # NCHW, Cmid
    u = u.reshape(N, Cout, r, r, H, W).transpose(0, 1, 4, 2, 5, 3)
    u = u.reshape(N, Cout, H * r, W * r)
    return u.astype(jnp.float32)                                   # NCHW out


# ----------------------------------------------------------------------------
# Pure-JAX (XLA) reference of the PyTorch module, for verification
# ----------------------------------------------------------------------------
def reference_forward(params, x_nchw, r):
    w3, b3 = params["conv_w"], params["conv_b"]
    a = params["prelu_a"][0]
    w1, b1 = params["conv1x1_w"], params["conv1x1_b"]
    y = jax.lax.conv_general_dilated(
        x_nchw, w3, window_strides=(1, 1), padding=((1, 1), (1, 1)),
        dimension_numbers=("NCHW", "OIHW", "NCHW"))
    y = y + b3[None, :, None, None]
    N, C, H, W = y.shape
    Cout = C // (r * r)
    y = y.reshape(N, Cout, r, r, H, W).transpose(0, 1, 4, 2, 5, 3)
    y = y.reshape(N, Cout, H * r, W * r)                      # PixelShuffle
    y = jnp.where(y > 0, y, a * y)                            # PReLU
    y = jnp.einsum("nchw,oc->nohw", y, w1.reshape(Cout, Cout))
    return y + b1[None, :, None, None]                        # Conv 1x1


# ----------------------------------------------------------------------------
# Deterministic parameters (same shapes as the PyTorch module)
# ----------------------------------------------------------------------------
def init_params(key, in_ch, out_ch, r):
    k1, k2, k3, k4 = jax.random.split(key, 4)
    cmid = out_ch * r * r
    return dict(
        conv_w=jax.random.normal(k1, (cmid, in_ch, 3, 3), jnp.float32)
        / jnp.sqrt(jnp.float32(in_ch * 9)),
        conv_b=0.1 * jax.random.normal(k2, (cmid,), jnp.float32),
        prelu_a=jnp.full((1,), 0.25, jnp.float32),            # nn.PReLU() default
        conv1x1_w=jax.random.normal(k3, (out_ch, out_ch, 1, 1), jnp.float32)
        / jnp.sqrt(jnp.float32(out_ch)),
        conv1x1_b=0.1 * jax.random.normal(k4, (out_ch,), jnp.float32),
    )


if __name__ == "__main__":
    key = jax.random.PRNGKey(0)
    pkey, xkey = jax.random.split(key)
    in_channels, out_channels, upscale = 4, 4, 2
    params = init_params(pkey, in_channels, out_channels, upscale)
    x = jax.random.normal(xkey, (2, in_channels, 16, 16), jnp.float32)

    fwd = jax.jit(upsample_block_forward, static_argnames=("upscale_factor",))
    out = fwd(params, x, upscale_factor=upscale)
    out = jax.block_until_ready(out)
    assert out.shape == (2, out_channels, 32, 32), out.shape

    ref = jax.block_until_ready(reference_forward(params, x, upscale))
    err = float(jnp.max(jnp.abs(out - ref)))
    scale = float(jnp.max(jnp.abs(ref)))
    # bf16 inputs/weights/output with f32 MXU accumulation -> loose tolerance
    assert err <= 5e-2 * scale + 1e-3, f"mismatch: max|err|={err}, max|ref|={scale}"
    print("KERNEL_OK")
</pallas_src>

<mosaic_0001>
module attributes {stable_mosaic.version = 11 : i64} {
  func.func @kernel(%arg0: i32, %arg1: i32, %arg2: memref<1x8x384xbf16, #tpu.memory_space<vmem>>, %arg3: memref<1x8x128xbf16, #tpu.memory_space<vmem>>, %arg4: memref<16x72xbf16, #tpu.memory_space<vmem>>, %arg5: memref<16x16xbf16, #tpu.memory_space<vmem>>, %arg6: memref<16x3xf32, #tpu.memory_space<vmem>>, %arg7: memref<1x16x384xbf16, #tpu.memory_space<vmem>>, %arg8: memref<8x512xbf16, #tpu.memory_space<vmem>>, %arg9: memref<72x384xbf16, #tpu.memory_space<vmem>>) attributes {dimension_semantics = [#tpu.dimension_semantics<parallel>, #tpu.dimension_semantics<parallel>], iteration_bounds = array<i64: 2, 1>, scalar_prefetch = 0 : i64, scratch_operands = 2 : i64, tpu.core_type = #tpu.core_type<tc>, window_params = [{transform_indices = @transform_0, window_bounds = array<i64: 1, 8, 384>}, {transform_indices = @transform_1, window_bounds = array<i64: 1, 8, 128>}, {pipeline_mode = #tpu.pipeline_mode<synchronous>, transform_indices = @transform_2, window_bounds = array<i64: 16, 72>}, {pipeline_mode = #tpu.pipeline_mode<synchronous>, transform_indices = @transform_3, window_bounds = array<i64: 16, 16>}, {pipeline_mode = #tpu.pipeline_mode<synchronous>, transform_indices = @transform_4, window_bounds = array<i64: 16, 3>}, {transform_indices = @transform_5, window_bounds = array<i64: 1, 16, 384>}]} {
    %c0 = arith.constant 0 : index
    %c0_0 = arith.constant 0 : index
    %c0_1 = arith.constant 0 : index
    %0 = vector.load %arg2[%c0, %c0_0, %c0_1] : memref<1x8x384xbf16, #tpu.memory_space<vmem>>, vector<1x8x384xbf16>
    %1 = vector.shape_cast %0 : vector<1x8x384xbf16> to vector<8x384xbf16>
    %c0_2 = arith.constant 0 : index
    %c0_3 = arith.constant 0 : index
    %2 = vector.load %arg8[%c0_2, %c0_3] : memref<8x512xbf16, #tpu.memory_space<vmem>>, vector<8x384xbf16>
    tpu.vector_store %arg8[%c0_2, %c0_3], %1 {strides = array<i32>} : memref<8x512xbf16, #tpu.memory_space<vmem>>, vector<8x384xbf16>,
    %c0_4 = arith.constant 0 : index
    %c0_5 = arith.constant 0 : index
    %c0_6 = arith.constant 0 : index
    %3 = vector.load %arg3[%c0_4, %c0_5, %c0_6] : memref<1x8x128xbf16, #tpu.memory_space<vmem>>, vector<1x8x128xbf16>
    %4 = vector.shape_cast %3 : vector<1x8x128xbf16> to vector<8x128xbf16>
    %c0_7 = arith.constant 0 : index
    %c384 = arith.constant 384 : index
    %5 = vector.load %arg8[%c0_7, %c384] : memref<8x512xbf16, #tpu.memory_space<vmem>>, vector<8x128xbf16>
    tpu.vector_store %arg8[%c0_7, %c384], %4 {strides = array<i32>} : memref<8x512xbf16, #tpu.memory_space<vmem>>, vector<8x128xbf16>,
    %c0_8 = arith.constant 0 : index
    %c0_9 = arith.constant 0 : index
    %6 = vector.load %arg8[%c0_8, %c0_9] : memref<8x512xbf16, #tpu.memory_space<vmem>>, vector<8x384xbf16>
    %c0_10 = arith.constant 0 : index
    %c0_11 = arith.constant 0 : index
    %7 = vector.load %arg9[%c0_10, %c0_11] : memref<72x384xbf16, #tpu.memory_space<vmem>>, vector<8x384xbf16>
    tpu.vector_store %arg9[%c0_10, %c0_11], %6 {strides = array<i32>} : memref<72x384xbf16, #tpu.memory_space<vmem>>, vector<8x384xbf16>,
    %c0_12 = arith.constant 0 : index
    %c1 = arith.constant 1 : index
    %8 = vector.load %arg8[%c0_12, %c1] : memref<8x512xbf16, #tpu.memory_space<vmem>>, vector<8x384xbf16>
    %c8 = arith.constant 8 : index
    %c0_13 = arith.constant 0 : index
    %9 = vector.load %arg9[%c8, %c0_13] : memref<72x384xbf16, #tpu.memory_space<vmem>>, vector<8x384xbf16>
    tpu.vector_store %arg9[%c8, %c0_13], %8 {strides = array<i32>} : memref<72x384xbf16, #tpu.memory_space<vmem>>, vector<8x384xbf16>,
    %c0_14 = arith.constant 0 : index
    %c2 = arith.constant 2 : index
    %10 = vector.load %arg8[%c0_14, %c2] : memref<8x512xbf16, #tpu.memory_space<vmem>>, vector<8x384xbf16>
    %c16 = arith.constant 16 : index
    %c0_15 = arith.constant 0 : index
    %11 = vector.load %arg9[%c16, %c0_15] : memref<72x384xbf16, #tpu.memory_space<vmem>>, vector<8x384xbf16>
    tpu.vector_store %arg9[%c16, %c0_15], %10 {strides = array<i32>} : memref<72x384xbf16, #tpu.memory_space<vmem>>, vector<8x384xbf16>,
    %c0_16 = arith.constant 0 : index
    %c18 = arith.constant 18 : index
    %12 = vector.load %arg8[%c0_16, %c18] : memref<8x512xbf16, #tpu.memory_space<vmem>>, vector<8x384xbf16>
    %c24 = arith.constant 24 : index
    %c0_17 = arith.constant 0 : index
    %13 = vector.load %arg9[%c24, %c0_17] : memref<72x384xbf16, #tpu.memory_space<vmem>>, vector<8x384xbf16>
    tpu.vector_store %arg9[%c24, %c0_17], %12 {strides = array<i32>} : memref<72x384xbf16, #tpu.memory_space<vmem>>, vector<8x384xbf16>,
    %c0_18 = arith.constant 0 : index
    %c19 = arith.constant 19 : index
    %14 = vector.load %arg8[%c0_18, %c19] : memref<8x512xbf16, #tpu.memory_space<vmem>>, vector<8x384xbf16>
    %c32 = arith.constant 32 : index
    %c0_19 = arith.constant 0 : index
    %15 = vector.load %arg9[%c32, %c0_19] : memref<72x384xbf16, #tpu.memory_space<vmem>>, vector<8x384xbf16>
    tpu.vector_store %arg9[%c32, %c0_19], %14 {strides = array<i32>} : memref<72x384xbf16, #tpu.memory_space<vmem>>, vector<8x384xbf16>,
    %c0_20 = arith.constant 0 : index
    %c20 = arith.constant 20 : index
    %16 = vector.load %arg8[%c0_20, %c20] : memref<8x512xbf16, #tpu.memory_space<vmem>>, vector<8x384xbf16>
    %c40 = arith.constant 40 : index
    %c0_21 = arith.constant 0 : index
    %17 = vector.load %arg9[%c40, %c0_21] : memref<72x384xbf16, #tpu.memory_space<vmem>>, vector<8x384xbf16>
    tpu.vector_store %arg9[%c40, %c0_21], %16 {strides = array<i32>} : memref<72x384xbf16, #tpu.memory_space<vmem>>, vector<8x384xbf16>,
    %c0_22 = arith.constant 0 : index
    %c36 = arith.constant 36 : index
    %18 = vector.load %arg8[%c0_22, %c36] : memref<8x512xbf16, #tpu.memory_space<vmem>>, vector<8x384xbf16>
    %c48 = arith.constant 48 : index
    %c0_23 = arith.constant 0 : index
    %19 = vector.load %arg9[%c48, %c0_23] : memref<72x384xbf16, #tpu.memory_space<vmem>>, vector<8x384xbf16>
    tpu.vector_store %arg9[%c48, %c0_23], %18 {strides = array<i32>} : memref<72x384xbf16, #tpu.memory_space<vmem>>, vector<8x384xbf16>,
    %c0_24 = arith.constant 0 : index
    %c37 = arith.constant 37 : index
    %20 = vector.load %arg8[%c0_24, %c37] : memref<8x512xbf16, #tpu.memory_space<vmem>>, vector<8x384xbf16>
    %c56 = arith.constant 56 : index
    %c0_25 = arith.constant 0 : index
    %21 = vector.load %arg9[%c56, %c0_25] : memref<72x384xbf16, #tpu.memory_space<vmem>>, vector<8x384xbf16>
    tpu.vector_store %arg9[%c56, %c0_25], %20 {strides = array<i32>} : memref<72x384xbf16, #tpu.memory_space<vmem>>, vector<8x384xbf16>,
    %c0_26 = arith.constant 0 : index
    %c38 = arith.constant 38 : index
    %22 = vector.load %arg8[%c0_26, %c38] : memref<8x512xbf16, #tpu.memory_space<vmem>>, vector<8x384xbf16>
    %c64 = arith.constant 64 : index
    %c0_27 = arith.constant 0 : index
    %23 = vector.load %arg9[%c64, %c0_27] : memref<72x384xbf16, #tpu.memory_space<vmem>>, vector<8x384xbf16>
    tpu.vector_store %arg9[%c64, %c0_27], %22 {strides = array<i32>} : memref<72x384xbf16, #tpu.memory_space<vmem>>, vector<8x384xbf16>,
    %c0_28 = arith.constant 0 : index
    %c0_29 = arith.constant 0 : index
    %24 = vector.load %arg4[%c0_28, %c0_29] : memref<16x72xbf16, #tpu.memory_space<vmem>>, vector<16x72xbf16>
    %c0_30 = arith.constant 0 : index
    %c0_31 = arith.constant 0 : index
    %25 = vector.load %arg9[%c0_30, %c0_31] : memref<72x384xbf16, #tpu.memory_space<vmem>>, vector<72x384xbf16>
    %cst = arith.constant dense<0.000000e+00> : vector<16x384xf32>
    %26 = tpu.matmul %24, %25, %cst {dimension_numbers = #tpu.dot_dimension_numbers<[1], [0], [0], [1], [0, 0, 1, 1], [], []>} : vector<16x72xbf16>, vector<72x384xbf16>, vector<16x384xf32> -> vector<16x384xf32>
    %c0_32 = arith.constant 0 : index
    %c0_33 = arith.constant 0 : index
    %27 = vector.load %arg6[%c0_32, %c0_33] : memref<16x3xf32, #tpu.memory_space<vmem>>, vector<16x1xf32>
    %c0_34 = arith.constant 0 : index
    %c1_35 = arith.constant 1 : index
    %28 = vector.load %arg6[%c0_34, %c1_35] : memref<16x3xf32, #tpu.memory_space<vmem>>, vector<16x1xf32>
    %c0_36 = arith.constant 0 : index
    %c2_37 = arith.constant 2 : index
    %29 = vector.load %arg6[%c0_36, %c2_37] : memref<16x3xf32, #tpu.memory_space<vmem>>, vector<16x1xf32>
    %30 = vector.broadcast %27 : vector<16x1xf32> to vector<16x384xf32>
    %31 = arith.addf %26, %30 : vector<16x384xf32>
    %cst_38 = arith.constant 0.000000e+00 : f32
    %32 = vector.broadcast %cst_38 : f32 to vector<16x384xf32>
    %33 = arith.cmpf ogt, %31, %32 : vector<16x384xf32>
    %34 = vector.broadcast %28 : vector<16x1xf32> to vector<16x384xf32>
    %35 = arith.mulf %34, %31 : vector<16x384xf32>
    %36 = arith.select %33, %31, %35 : vector<16x384xi1>, vector<16x384xf32>
    %c0_39 = arith.constant 0 : index
    %c0_40 = arith.constant 0 : index
    %37 = vector.load %arg5[%c0_39, %c0_40] : memref<16x16xbf16, #tpu.memory_space<vmem>>, vector<16x16xbf16>
    %38 = arith.truncf %36 : vector<16x384xf32> to vector<16x384xbf16>
    %cst_41 = arith.constant dense<0.000000e+00> : vector<16x384xf32>
    %39 = tpu.matmul %37, %38, %cst_41 {dimension_numbers = #tpu.dot_dimension_numbers<[1], [0], [0], [1], [0, 0, 1, 1], [], []>} : vector<16x16xbf16>, vector<16x384xbf16>, vector<16x384xf32> -> vector<16x384xf32>
    %40 = vector.broadcast %29 : vector<16x1xf32> to vector<16x384xf32>
    %41 = arith.addf %39, %40 : vector<16x384xf32>
    %42 = arith.truncf %41 : vector<16x384xf32> to vector<16x384xbf16>
    %c0_42 = arith.constant 0 : index
    %c0_43 = arith.constant 0 : index
    %c0_44 = arith.constant 0 : index
    %43 = vector.load %arg7[%c0_42, %c0_43, %c0_44] : memref<1x16x384xbf16, #tpu.memory_space<vmem>>, vector<1x16x384xbf16>
    %44 = vector.shape_cast %43 : vector<1x16x384xbf16> to vector<16x384xbf16>
    %45 = vector.shape_cast %42 : vector<16x384xbf16> to vector<1x16x384xbf16>
    tpu.vector_store %arg7[%c0_42, %c0_43, %c0_44], %45 {strides = array<i32>} : memref<1x16x384xbf16, #tpu.memory_space<vmem>>, vector<1x16x384xbf16>,
    return
  }
  func.func @transform_0(%arg0: i32, %arg1: i32) -> (i32, i32, i32) {
    %c0_i32 = arith.constant 0 : i32
    %c0_i32_0 = arith.constant 0 : i32
    return %arg0, %c0_i32, %arg1 : i32, i32, i32
  }
  func.func @transform_1(%arg0: i32, %arg1: i32) -> (i32, i32, i32) {
    %c0_i32 = arith.constant 0 : i32
    %c0_i32_0 = arith.constant 0 : i32
    return %arg0, %arg1, %c0_i32 : i32, i32, i32
  }
  func.func @transform_2(%arg0: i32, %arg1: i32) -> (i32, i32) {
    %c0_i32 = arith.constant 0 : i32
    %c0_i32_0 = arith.constant 0 : i32
    %c0_i32_1 = arith.constant 0 : i32
    return %c0_i32, %c0_i32_0 : i32, i32
  }
  func.func @transform_3(%arg0: i32, %arg1: i32) -> (i32, i32) {
    %c0_i32 = arith.constant 0 : i32
    %c0_i32_0 = arith.constant 0 : i32
    %c0_i32_1 = arith.constant 0 : i32
    return %c0_i32, %c0_i32_0 : i32, i32
  }
  func.func @transform_4(%arg0: i32, %arg1: i32) -> (i32, i32) {
    %c0_i32 = arith.constant 0 : i32
    %c0_i32_0 = arith.constant 0 : i32
    %c0_i32_1 = arith.constant 0 : i32
    return %c0_i32, %c0_i32_0 : i32, i32
  }
  func.func @transform_5(%arg0: i32, %arg1: i32) -> (i32, i32, i32) {
    %c0_i32 = arith.constant 0 : i32
    %c0_i32_0 = arith.constant 0 : i32
    return %arg0, %c0_i32, %arg1 : i32, i32, i32
  }
}

</mosaic_0001>

<bundles_post_ra>
// kernel: upsample_block_forward.1
= control target key start
LH: loop header
LB: loop body
LE: loop exit
PB: predicated region body
PF: predicated region fallthrough
CT: control target
= control target key end

     0   :  { %s1100_s18 = smov 0   ;;  %s1102_s19 = smov 0   ;;  %s1200_s0 = inlined_call_operand.vmem [shape: bf16[2,8,384], index: 0, kind: input, shape index: {}]   ;;  %s1201_s1 = inlined_call_operand.vmem [shape: bf16[2,8,128], index: 1, kind: input, shape index: {}]   ;;  %s1202_s2 = inlined_call_operand.vmem [shape: bf16[16,72], index: 2, kind: input, shape index: {}]   ;;  %s1203_s3 = inlined_call_operand.vmem [shape: bf16[16,16], index: 3, kind: input, shape index: {}]   ;;  %s1204_s4 = inlined_call_operand.vmem [shape: f32[16,3], index: 4, kind: input, shape index: {}]   ;;  %s1205_s5 = inlined_call_operand.vmem [shape: bf16[2,16,384], index: 5, kind: output, shape index: {}]  }
   0x1   :  { %s1104_s20 = smov 0  }
   0x2 LB: > { %s27_s21 = sadd.s32 1, %s1051_s19  ;;  %p917_p0 = scmp.ge.s32.totalorder %s1055_s20, 1  ;;  %s1055_s20 = sphi %s1104_s20, %s15_s20   ;;  %s1051_s19 = sphi %s1102_s19, %s1207_s19   ;;  %s1047_s18 = sphi %s1100_s18, %s1206_s18  }
   0x3   : > { %p29_p1 = scmp.ge.s32.totalorder %s27_s21, 2  ;;  %p222_p2 = scmp.lt.s32.totalorder %s1055_s20, 3 }
   0x5   : > { %s1209_s21 = smov (%p29_p1, %s27_s21), 0  ;;  %p223_p3 = pnand %p917_p0, %p222_p2 }
   0x6   : > { %p266_p4 = scmp.lt.s32.totalorder (!%p223_p3), %s1047_s18, 1  ;;  %s1057_s30 = smov (!%p223_p3), 126   ;;  %v1059_v3 = vmov (!%p223_p3), 0.0   ;;  %v1065_v6 = vmov (!%p223_p3), 0   ;;  %vm1067_vm0 = vmmov (!%p223_p3), 0   ;;  %v1147_v7 = vld [vmem:[%s1204_s4 + $0x8] sm:$0xff] (!%p223_p3) }
   0x7   : > { %226 = sbr.rel (%p223_p3) target bundleno = 624 (0x270), region = 40  ;;  %s1058_s6 = smov (!%p223_p3), 127   ;;  %961 = vmatprep.subr.bf16.mxu1 (!%p223_p3), %v1059_v3  ;;  %603 = vmatprep.mubr.bf16.mxu0 (!%p223_p3), %v1065_v6  ;;  %v1152_v8 = vld [vmem:[%s1204_s4] sm:$0xff] (!%p223_p3)  ;;  %v1068_v9 = vmov (!%p223_p3), 1   ;;  %vm313_vm1 = vcmask (!%p223_p3), 1043456   ;;  %vm333_vm2 = vcmask (!%p223_p3), 1031168  }
   0x8   : > { %s1060_s7 = smov (!%p223_p3), 110   ;;  %s1061_s8 = smov (!%p223_p3), 109   ;;  %1021 = vset.pattern.permute.xlu1 (!%p223_p3), %v1065_v6  ;;  %1020 = vset.pattern.permute.xlu0 (!%p223_p3), %v1065_v6  ;;  %vm315_vm3 = vcmask (!%p223_p3), 1039360   ;;  %vm351_vm4 = vcmask (!%p223_p3), 900096   ;;  %vm369_vm5 = vcmask (!%p223_p3), 891904   ;;  %vm387_vm6 = vcmask (!%p223_p3), 883712  }
   0x9   : > { %s1062_s9 = smov (!%p223_p3), 108   ;;  %s1063_s10 = smov (!%p223_p3), 92   ;;  %971 = vmatprep.mubr.msk.bf16.mxu1 (!%p223_p3), %vm1067_vm0, %v1059_v3  ;;  %vm405_vm7 = vcmask (!%p223_p3), 752640   ;;  %vm423_vm8 = vcmask (!%p223_p3), 744448   ;;  %vm441_vm9 = vcmask (!%p223_p3), 736256   ;;  %vm557_vm10 = vcmask (!%p223_p3), 588800  }
   0xa   : > { %s1064_s11 = smov (!%p223_p3), 91   ;;  %s1066_s12 = smov (!%p223_p3), 90  }
   0xe   : > { %s1211_s18 = smov (!%p266_p4, %s1047_s18), 1 }
   0xf   : > { %s981_s22 = smul.u32 12, %s1211_s18  ;;  %s919_s23 = sshll.u32 %s1211_s18, 2 }
  0x10   : > { %s281_s26 = scalar_lea.vmem %s1201_s1, %s919_s23  ;;  %s982_s25 = smul.u32 24, %s1211_s18 }
  0x11   : > { %s273_s29 = scalar_lea.vmem %s1200_s0, %s981_s22  ;;  %v297_v0 = vld [vmem:[%s281_s26] sm:$0xf] }
  0x12   : > { %v1128_v1 = vld [vmem:[%s273_s29] sm:$0xff]  ;;  %v294_v2 = vld [vmem:[%s273_s29 + $0x8] sm:$0xf]  ;;  %298 = vst [vmem:[#allocation2 + $0xc] sm:$0xf] %v297_v0  ;;  %s290_s28 = scalar_lea.vmem %s1205_s5, %s982_s25 }
  0x13   : > { %326 = vrot.lane.b32.xlu1 %v1128_v1, %s1057_s30  ;;  %307 = vrot.lane.b32.xlu0 %v1128_v1, %s1058_s6  ;;  %296 = vst [vmem:[#allocation2 + $0x8] sm:$0xf] %v294_v2 }
  0x1a   : > { %v323_v4 = vld [vmem:[#allocation2 + $0x8] sm:$0xff] }
  0x1b   : > { %v300_v5 = vld [vmem:[#allocation2 + $0x8] sm:$0xf]  ;;  %328 = vrot.lane.b32.xlu1 %v323_v4, %s1057_s30  ;;  %309 = vrot.lane.b32.xlu0 %v323_v4, %s1058_s6 }
  0x1c   : > { %302 = vst [vmem:[#allocation3 + $0x8] sm:$0xf] %v300_v5 }
  0x1f   : > { %346 = vrot.lane.b32.xlu1 %v323_v4, %s1060_s7  ;;  %344 = vrot.lane.b32.xlu0 %v1128_v1, %s1060_s7 }
  0x23   : > { %364 = vrot.lane.b32.xlu1 %v323_v4, %s1061_s8  ;;  %362 = vrot.lane.b32.xlu0 %v1128_v1, %s1061_s8 }
  0x27   : > { %382 = vrot.lane.b32.xlu1 %v323_v4, %s1062_s9  ;;  %380 = vrot.lane.b32.xlu0 %v1128_v1, %s1062_s9 }
  0x2b   : > { %400 = vrot.lane.b32.xlu1 %v323_v4, %s1063_s10  ;;  %398 = vrot.lane.b32.xlu0 %v1128_v1, %s1063_s10 }
  0x2f   : > { %418 = vrot.lane.b32.xlu1 %v323_v4, %s1064_s11  ;;  %416 = vrot.lane.b32.xlu0 %v1128_v1, %s1064_s11 }
  0x33   : > { %436 = vrot.lane.b32.xlu1 %v323_v4, %s1066_s12  ;;  %434 = vrot.lane.b32.xlu0 %v1128_v1, %s1066_s12 }
  0x37   : > { %477 = vperm.xlu1 %1021, %v1147_v7   ;;  %472 = vperm.xlu0 %1020, %v1152_v8  }
  0x3b   : > { %1022 = vset.pattern.permute.xlu1 %v1068_v9  ;;  %1023 = vset.pattern.permute.xlu0 %v1068_v9 }
  0x3c   : > { %662 = vperm.xlu1 %1022, %v1152_v8   ;;  %666 = vperm.xlu0 %1023, %v1147_v7  }
  0x85   : > { %v327_v10 = vpop.permute.xlu1 %326  ;;  %v308_v11 = vpop.permute.xlu0 %307 }
  0x86   : > { %v311_v12 = vrot.slane %v308_v11, 4  ;;  %v330_v15 = vrot.slane %v327_v10, 4 }
  0x8d   : > { %v329_v13 = vpop.permute.xlu1 %328  ;;  %v310_v14 = vpop.permute.xlu0 %309 }
  0x8e   : > { %v331_v16 = vrot.slane %v329_v13, 4  ;;  %v312_v17 = vrot.slane %v310_v14, 4 }
  0x90   : > { %v332_v18 = vsel %vm313_vm1, %v330_v15, %v331_v16  ;;  %v335_v19 = vsel %vm333_vm2, %v329_v13, %v331_v16  ;;  %v314_v20 = vsel %vm313_vm1, %v311_v12, %v312_v17  ;;  %v317_v21 = vsel %vm315_vm3, %v310_v14, %v312_v17 }
  0x91   : > { %v334_v22 = vsel %vm333_vm2, %v327_v10, %v332_v18  ;;  %339 = vst [vmem:[#allocation3 + $0x20] sm:$0xf] %v335_v19  ;;  %v316_v23 = vsel %vm315_vm3, %v308_v11, %v314_v20  ;;  %321 = vst [vmem:[#allocation3 + $0x14] sm:$0xf] %v317_v21  ;;  %v347_v24 = vpop.permute.xlu1 %346  ;;  %v345_v25 = vpop.permute.xlu0 %344  ;;  %v1031_v21 = vld [vmem:[%s1202_s2] sm:$0xff]  }
  0x92   : > { %v349_v26 = vrot.slane %v347_v24, 4  ;;  %v348_v27 = vrot.slane %v345_v25, 4  ;;  %v923_v28 = vcombine.high %v1128_v1, %v316_v23  ;;  %v922_v29 = vcombine.low %v1128_v1, %v316_v23 }
  0x94   : > { %v353_v30 = vsel %vm351_vm4, %v347_v24, %v349_v26  ;;  %v350_v31 = vsel %vm313_vm1, %v348_v27, %v349_v26  ;;  %571 = vmatprep.subr.bf16.mxu0 %v923_v28  ;;  %v1069_v24 = vmov 2  }
  0x95   : > { %357 = vst [vmem:[#allocation3 + $0x2c] sm:$0xf] %v353_v30  ;;  %v352_v32 = vsel %vm351_vm4, %v345_v25, %v350_v31  ;;  %v365_v33 = vpop.permute.xlu1 %364  ;;  %v363_v34 = vpop.permute.xlu0 %362  ;;  %572 = vmatpush1.bf16.msra.mxu0 %v922_v29  ;;  %1024 = vset.pattern.permute.xlu1 %v1069_v24 }
  0x96   : > { %v367_v35 = vrot.slane %v365_v33, 4  ;;  %v366_v36 = vrot.slane %v363_v34, 4  ;;  %v926_v37 = vcombine.high %v334_v22, %v352_v32  ;;  %v925_v38 = vcombine.low %v334_v22, %v352_v32  ;;  %1025 = vset.pattern.permute.xlu0 %v1069_v24  ;;  %687 = vperm.xlu1 %1024, %v1152_v8  }
  0x98   : > { %v371_v39 = vsel %vm369_vm5, %v365_v33, %v367_v35  ;;  %v368_v40 = vsel %vm313_vm1, %v366_v36, %v367_v35  ;;  %v1026_v41 = vld [vmem:[#allocation3 + $0x8] ss:$12 sps:$4 sm:$0xff]   ;;  %573 = vmatprep.subr.bf16.mxu0 %v926_v37 }
  0x99   : > { %375 = vst [vmem:[#allocation3 + $0x38] sm:$0xf] %v371_v39  ;;  %v370_v42 = vsel %vm369_vm5, %v363_v34, %v368_v40  ;;  %v383_v43 = vpop.permute.xlu1 %382  ;;  %v381_v44 = vpop.permute.xlu0 %380  ;;  %574 = vmatpush1.bf16.msra.mxu0 %v925_v38  ;;  %962 = vmatpush3.bf16.msra.mxu1 %v1026_v41 }
  0x9a   : > { %v385_v45 = vrot.slane %v383_v43, 4  ;;  %v384_v46 = vrot.slane %v381_v44, 4  ;;  %963 = vmatprep.subr.bf16.mxu1 %v1059_v3  ;;  %691 = vperm.xlu1 %1024, %v1147_v7  }
  0x9c   : > { %v389_v47 = vsel %vm387_vm6, %v383_v43, %v385_v45  ;;  %v386_v48 = vsel %vm313_vm1, %v384_v46, %v385_v45  ;;  %v1027_v49 = vld [vmem:[#allocation3 + $0x20] ss:$12 sps:$4 sm:$0xff]  }
  0x9d   : > { %393 = vst [vmem:[#allocation3 + $0x44] sm:$0xf] %v389_v47  ;;  %v388_v50 = vsel %vm387_vm6, %v381_v44, %v386_v48  ;;  %v401_v51 = vpop.permute.xlu1 %400  ;;  %v399_v52 = vpop.permute.xlu0 %398  ;;  %964 = vmatpush3.bf16.msra.mxu1 %v1027_v49 }
  0x9e   : > { %v403_v53 = vrot.slane %v401_v51, 4  ;;  %v402_v54 = vrot.slane %v399_v52, 4  ;;  %v929_v55 = vcombine.high %v370_v42, %v388_v50  ;;  %v928_v56 = vcombine.low %v370_v42, %v388_v50  ;;  %965 = vmatprep.subr.bf16.mxu1 %v1059_v3 }
  0xa0   : > { %v407_v57 = vsel %vm405_vm7, %v401_v51, %v403_v53  ;;  %v404_v58 = vsel %vm313_vm1, %v402_v54, %v403_v53  ;;  %575 = vmatprep.subr.bf16.mxu0 %v929_v55  ;;  %v1032_v51 = vld [vmem:[%s1203_s3] sm:$0xff]  }
  0xa1   : > { %411 = vst [vmem:[#allocation3 + $0x50] sm:$0xf] %v407_v57  ;;  %v406_v59 = vsel %vm405_vm7, %v399_v52, %v404_v58  ;;  %v419_v60 = vpop.permute.xlu1 %418  ;;  %v417_v61 = vpop.permute.xlu0 %416  ;;  %576 = vmatpush1.bf16.msra.mxu0 %v928_v56 }
  0xa2   : > { %v421_v62 = vrot.slane %v419_v60, 4  ;;  %v420_v63 = vrot.slane %v417_v61, 4 }
  0xa4   : > { %v425_v0 = vsel %vm423_vm8, %v419_v60, %v421_v62  ;;  %v422_v1 = vsel %vm313_vm1, %v420_v63, %v421_v62  ;;  %v1028_v2 = vld [vmem:[#allocation3 + $0x38] ss:$12 sps:$4 sm:$0xff]  }
  0xa5   : > { %429 = vst [vmem:[#allocation3 + $0x5c] sm:$0xf] %v425_v0  ;;  %v424_v4 = vsel %vm423_vm8, %v417_v61, %v422_v1  ;;  %v437_v5 = vpop.permute.xlu1 %436  ;;  %v435_v9 = vpop.permute.xlu0 %434  ;;  %966 = vmatpush3.bf16.msra.mxu1 %v1028_v2 }
  0xa6   : > { %v439_v10 = vrot.slane %v437_v5, 4  ;;  %v438_v11 = vrot.slane %v435_v9, 4  ;;  %v932_v12 = vcombine.high %v406_v59, %v424_v4  ;;  %v931_v13 = vcombine.low %v406_v59, %v424_v4  ;;  %967 = vmatprep.subr.bf16.mxu1 %v1059_v3 }
  0xa8   : > { %v443_v14 = vsel %vm441_vm9, %v437_v5, %v439_v10  ;;  %v440_v15 = vsel %vm313_vm1, %v438_v11, %v439_v10  ;;  %577 = vmatprep.subr.bf16.mxu0 %v932_v12 }
  0xa9   : > { %447 = vst [vmem:[#allocation3 + $0x68] sm:$0xf] %v443_v14  ;;  %v442_v16 = vsel %vm441_vm9, %v435_v9, %v440_v15  ;;  %578 = vmatpush1.bf16.msra.mxu0 %v931_v13 }
  0xaa   : > { %v935_v17 = vcombine.high %v442_v16, %v442_v16  ;;  %v934_v18 = vcombine.low %v442_v16, %v442_v16 }
  0xac   : > { %v1029_v19 = vld [vmem:[#allocation3 + $0x50] ss:$12 sps:$4 sm:$0xff]   ;;  %937 = vmatprep.subr.msk.bf16.mxu0 %vm313_vm1, %v935_v17  ;;  %v563_v20 = vsel %vm313_vm1, %v934_v18, 0 }
  0xad   : > { %580 = vmatpush1.bf16.msra.mxu0 %v563_v20  ;;  %968 = vmatpush3.bf16.msra.mxu1 %v1029_v19 }
  0xae   : > { %969 = vmatprep.subr.bf16.mxu1 %v1059_v3 }
  0xb0   : > { %v1030_v22 = vld [vmem:[#allocation3 + $0x68] ss:$0 sps:$4 sm:$0xff]   ;;  %938 = vmatmul.mubr.msk.bf16.vlgmr.msra.gmra.mrb[0].mxu0 %vm557_vm10, %v1031_v21 }
  0xb1   : > { %735 = vmatprep.mubr.bf16.mxu0 %v1065_v6  ;;  %v569_v23 = vsel %vm313_vm1, %v1030_v22, 0  ;;  %vm699_vm1 = vcmask 130048  }
  0xb2   : > { %970 = vmatpush3.bf16.msra.mxu1 %v569_v23 }
  0xb3   : > { %975 = vmatprep.subr.bf16.mxu1 %v1059_v3 }
  0xb5   : > { %972 = vmatmul.mubr.msk.bf16.vlgmr.msra.gmra.mrb[0].mxu1 %vm557_vm10, %v1031_v21 }
  0xb6   : > { %977 = vmatprep.mubr.msk.bf16.mxu1 %vm1067_vm0, %v1059_v3  ;;  %v478_v25 = vpop.permute.xlu1 %477  ;;  %v473_v26 = vpop.permute.xlu0 %472 }
  0xbb   : > { %v663_v6 = vpop.permute.xlu1 %662  ;;  %v667_v32 = vpop.permute.xlu0 %666 }
 0x115   : > { %v688_v55 = vpop.permute.xlu1 %687 }
 0x119   : > { %v692_v57 = vpop.permute.xlu1 %691 }
 0x183   : > { %v605_v27 = vpop.f32.mrb[0].mxu0 }
 0x184   : > { %v606_v28 = vadd.f32 %v605_v27, %v473_v26  ;;  %v607_v29 = vpop.f32.mrb[1].mxu0 }
 0x185   : > { %v608_v30 = vadd.f32 %v607_v29, %v473_v26  ;;  %v609_v31 = vpop.f32.mrb[2].mxu0 }
 0x186   : > { %vm655_vm11 = vcmp.gt.f32.partialorder %v606_v28, 0.0  ;;  %v669_v33 = vmul.f32 %v663_v6, %v606_v28  ;;  %v610_v34 = vadd.f32 %v609_v31, %v478_v25  ;;  %v611_v3 = vpop.f32.mrb[3].mxu0 }
 0x187   : > { %v670_v35 = vmul.f32 %v663_v6, %v608_v30  ;;  %v612_v36 = vadd.f32 %v611_v3, %v478_v25  ;;  %vm656_vm12 = vcmp.gt.f32.partialorder %v608_v30, 0.0 }
 0x188   : > { %v675_v37 = vsel %vm655_vm11, %v606_v28, %v669_v33  ;;  %vm658_vm13 = vcmp.gt.f32.partialorder %v610_v34, 0.0  ;;  %v672_v8 = vmul.f32 %v667_v32, %v610_v34  ;;  %v648_v7 = vpop.f32.mrb[0].mxu1 }
 0x189   : > { %vm659_vm14 = vcmp.gt.f32.partialorder %v612_v36, 0.0  ;;  %v673_v38 = vmul.f32 %v667_v32, %v612_v36  ;;  %v649_v39 = vadd.f32 %v648_v7, %v473_v26  ;;  %v973_v40 = vpop.f32.mrb[1].mxu1  ;;  %v676_v44 = vsel %vm656_vm12, %v608_v30, %v670_v35 }
 0x18a   : > { %v678_v41 = vsel %vm658_vm13, %v610_v34, %v672_v8  ;;  %v651_v42 = vpop.f32.mrb[2].mxu1 }
 0x18b   : > { %v683_v43 = vpack.c.bf16 %v678_v41, %v675_v37  ;;  %v679_v45 = vsel %vm659_vm14, %v612_v36, %v673_v38  ;;  %v671_v46 = vmul.f32 %v663_v6, %v649_v39  ;;  %v652_v47 = vadd.f32 %v651_v42, %v478_v25  ;;  %v974_v48 = vpop.f32.mrb[3].mxu1 }
 0x18c   : > { %v684_v49 = vpack.c.bf16 %v679_v45, %v676_v44  ;;  %vm657_vm15 = vcmp.gt.f32.partialorder %v649_v39, 0.0 }
 0x18d   : > { %vm660_vm0 = vcmp.gt.f32.partialorder %v652_v47, 0.0  ;;  %v674_v50 = vmul.f32 %v667_v32, %v652_v47  ;;  %v677_v52 = vsel %vm657_vm15, %v649_v39, %v671_v46 }
 0x18e   : > { %703 = vmatprep.subr.bf16.mxu0 %v684_v49 }
 0x18f   : > { %704 = vmatpush1.bf16.msra.mxu0 %v683_v43  ;;  %v680_v53 = vsel %vm660_vm0, %v652_v47, %v674_v50 }
 0x190   : > { %v685_v54 = vpack.c.bf16 %v680_v53, %v677_v52 }
 0x192   : > { %941 = vmatmul.mubr.msk.bf16.vlgmr.msra.gmra.mrb[4].mxu0 %vm699_vm1, %v1032_v51  ;;  %976 = vmatpush3.bf16.msra.mxu1 %v685_v54 }
 0x195   : > { %978 = vmatmul.mubr.msk.bf16.vlgmr.msra.gmra.mrb[4].mxu1 %vm699_vm1, %v1032_v51 }
 0x265   : > { %v737_v56 = vpop.f32.mrb[4].mxu0 }
 0x266   : > { %v738_v58 = vadd.f32 %v737_v56, %v688_v55  ;;  %v739_v59 = vpop.f32.mrb[5].mxu0 }
 0x267   : > { %v740_v60 = vadd.f32 %v739_v59, %v688_v55  ;;  %v741_v61 = vpop.f32.mrb[6].mxu0 }
 0x268   : > { %v742_v62 = vadd.f32 %v741_v61, %v692_v57  ;;  %v743_v63 = vpop.f32.mrb[7].mxu0  ;;  %v780_v1 = vpop.f32.mrb[4].mxu1 }
 0x269   : > { %v949_v0 = vpack.c.bf16 %v740_v60, %v738_v58  ;;  %v744_v2 = vadd.f32 %v743_v63, %v692_v57  ;;  %v781_v4 = vadd.f32 %v780_v1, %v688_v55  ;;  %v979_v5 = vpop.f32.mrb[5].mxu1 }
 0x26a   : > { %v783_v10 = vpop.f32.mrb[6].mxu1 }
 0x26b   : > { %807 = vst [vmem:[%s290_s28] sm:$0xff] %v949_v0  ;;  %v951_v9 = vpack.c.bf16 %v744_v2, %v742_v62  ;;  %v950_v11 = vpack.c.bf16 %v781_v4, %v781_v4  ;;  %v784_v12 = vadd.f32 %v783_v10, %v692_v57  ;;  %v980_v13 = vpop.f32.mrb[7].mxu1 }
 0x26d   : > { %809 = vst [vmem:[%s290_s28 + $0xc] sm:$0xff] %v951_v9  ;;  %808 = vst [vmem:[%s290_s28 + $0x8] sm:$0xf] %v950_v11  ;;  %v952_v14 = vpack.c.bf16 %v784_v12, %v784_v12 }
 0x26f   : > { %810 = vst [vmem:[%s290_s28 + $0x14] sm:$0xf] %v952_v14 }
 0x270 PF: > { %s15_s20 = sadd.s32 1, %s1055_s20   ;;  %s1206_s18 = smov %s1051_s19 }
 0x271   : > { %p12_p5 = scmp.ge.s32.totalorder %s15_s20, 4   ;;  %s1207_s19 = smov %s1209_s21 }
 0x273   :  { %14 = sbr.rel (!%p12_p5) target bundleno = 2 (0x2), region = 73 }

</bundles_post_ra>
